<compile_context>
chip_gen: v5e
topology: v5e:2x2
jax: 0.10.0
libtpu: 0.0.40
codegen_flags: <defaults>
</compile_context>

<pallas_src>
import functools

import jax
import jax.numpy as jnp
from jax.experimental import pallas as pl
from jax.experimental.pallas import tpu as pltpu


def _choose_tile_l(L, TB, D, itemsize, target_bytes=4 << 20):
    """Pick an L-tile: full L for small inputs, else a multiple of 8 sized so
    the (double-buffered) input tile stays well under the VMEM budget on all
    of v5e / v6e / v7x."""
    if L <= 8:
        return L
    tl = target_bytes // max(1, TB * D * itemsize)
    tl = max(8, min(tl, 2048, L))
    tl = (tl // 8) * 8
    if tl >= L:
        return L
    return tl


def _make_stat_pool_kernel(L, TL):
    needs_mask = (L % TL) != 0
    inv_l = 1.0 / float(L)

    def kernel(x_ref, mean_ref, std_ref, sum_sc, sumsq_sc):
        k = pl.program_id(1)

        @pl.when(k == 0)
        def _init():
            sum_sc[...] = jnp.zeros_like(sum_sc)
            sumsq_sc[...] = jnp.zeros_like(sumsq_sc)

        # Tile stays in native dtype in VMEM; promote per-tile for accumulation.
        xf = x_ref[...].astype(jnp.float32)              # [TB, TL, D]
        if needs_mask:
            row = jax.lax.broadcasted_iota(jnp.int32, xf.shape, 1)
            valid = (k * TL + row) < L
            xf = jnp.where(valid, xf, 0.0)

        sum_sc[...] += jnp.sum(xf, axis=1)               # [TB, D]
        sumsq_sc[...] += jnp.sum(xf * xf, axis=1)        # [TB, D]

        @pl.when(k == pl.num_programs(1) - 1)
        def _finalize():
            mean = sum_sc[...] * inv_l
            var = sumsq_sc[...] * inv_l - mean * mean
            var = jnp.maximum(var, 0.0)                  # guard cancellation
            std = jnp.sqrt(var + 1e-12)
            mean_ref[...] = mean.astype(mean_ref.dtype)
            std_ref[...] = std.astype(std_ref.dtype)

    return kernel


@functools.partial(jax.jit, static_argnames=("input_dim", "tile_l"))
def statistic_pooling(x, input_dim, tile_l=None):
    """Pallas implementation of StatisticPooling.forward.

    Accepts x of shape [B, L, D] or anything reshapeable to
    (x.shape[0], x.shape[-2], -1), mirroring the PyTorch module.
    """
    if x.ndim != 3:
        x = x.reshape(x.shape[0], x.shape[-2], -1)
    assert x.shape[-1] == input_dim, (x.shape, input_dim)
    B, L, D = x.shape

    TB = B if B <= 8 else 8
    TL = tile_l if tile_l is not None else _choose_tile_l(
        L, TB, D, x.dtype.itemsize)
    TL = min(TL, L)

    grid = (pl.cdiv(B, TB), pl.cdiv(L, TL))
    kernel = _make_stat_pool_kernel(L, TL)

    mean, std = pl.pallas_call(
        kernel,
        out_shape=(jax.ShapeDtypeStruct((B, D), x.dtype),
                   jax.ShapeDtypeStruct((B, D), x.dtype)),
        grid_spec=pltpu.PrefetchScalarGridSpec(
            num_scalar_prefetch=0,
            grid=grid,
            in_specs=[pl.BlockSpec((TB, TL, D), lambda i, k: (i, k, 0))],
            out_specs=[pl.BlockSpec((TB, D), lambda i, k: (i, 0)),
                       pl.BlockSpec((TB, D), lambda i, k: (i, 0))],
            scratch_shapes=[pltpu.VMEM((TB, D), jnp.float32),
                            pltpu.VMEM((TB, D), jnp.float32)]),
        compiler_params=pltpu.CompilerParams(
            dimension_semantics=("parallel", "arbitrary"),
            vmem_limit_bytes=64 << 20),
    )(x)

    # Lane-dense stores inside the kernel; the cheap concat happens here.
    return jnp.concatenate([mean, std], axis=1)


def _reference(x, input_dim):
    if x.ndim != 3:
        x = x.reshape(x.shape[0], x.shape[-2], -1)
    xf = x.astype(jnp.float32)
    mean = jnp.mean(xf, axis=1)
    var = jnp.var(xf, axis=1)                 # biased (ddof=0) == unbiased=False
    std = jnp.sqrt(var + 1e-12)
    return jnp.concatenate([mean, std], axis=1).astype(x.dtype)


if __name__ == "__main__":
    key = jax.random.PRNGKey(0)

    # Test 1: small shape, single L tile.
    B, L, D = 2, 8, 32
    x = jax.random.normal(key, (B, L, D), dtype=jnp.float32)
    out = jax.block_until_ready(statistic_pooling(x, input_dim=D))
    ref = _reference(x, input_dim=D)
    assert out.shape == (B, 2 * D), out.shape
    assert jnp.allclose(out, ref, atol=1e-4, rtol=1e-4), (
        float(jnp.max(jnp.abs(out - ref))))

    # Test 2: tiled L with a remainder tile (exercises masking + accumulator).
    B2, L2, D2 = 3, 200, 48
    key2 = jax.random.PRNGKey(0)
    x2 = jax.random.normal(key2, (B2, L2, D2), dtype=jnp.float32)
    out2 = jax.block_until_ready(statistic_pooling(x2, input_dim=D2, tile_l=64))
    ref2 = _reference(x2, input_dim=D2)
    assert out2.shape == (B2, 2 * D2), out2.shape
    assert jnp.allclose(out2, ref2, atol=1e-4, rtol=1e-4), (
        float(jnp.max(jnp.abs(out2 - ref2))))

    print("KERNEL_OK")
</pallas_src>

<mosaic_0001>
module attributes {stable_mosaic.version = 11 : i64} {
  func.func @kernel(%arg0: i32, %arg1: i32, %arg2: memref<2x8x32xf32, #tpu.memory_space<vmem>>, %arg3: memref<2x32xf32, #tpu.memory_space<vmem>>, %arg4: memref<2x32xf32, #tpu.memory_space<vmem>>, %arg5: memref<2x32xf32, #tpu.memory_space<vmem>>, %arg6: memref<2x32xf32, #tpu.memory_space<vmem>>) attributes {dimension_semantics = [#tpu.dimension_semantics<parallel>, #tpu.dimension_semantics<arbitrary>], iteration_bounds = array<i64: 1, 1>, scalar_prefetch = 0 : i64, scratch_operands = 2 : i64, tpu.core_type = #tpu.core_type<tc>, window_params = [{transform_indices = @transform_0, window_bounds = array<i64: 2, 8, 32>}, {transform_indices = @transform_1, window_bounds = array<i64: 2, 32>}, {transform_indices = @transform_2, window_bounds = array<i64: 2, 32>}]} {
    %c0_i32 = arith.constant 0 : i32
    %0 = arith.cmpi eq, %arg1, %c0_i32 : i32
    %1 = arith.extui %0 : i1 to i32
    %c0_i32_0 = arith.constant 0 : i32
    %2 = arith.cmpi ne, %1, %c0_i32_0 : i32
    scf.if %2 {
      %cst_14 = arith.constant 0.000000e+00 : f32
      %16 = vector.broadcast %cst_14 : f32 to vector<2x32xf32>
      %c0_15 = arith.constant 0 : index
      %c0_16 = arith.constant 0 : index
      %17 = vector.load %arg5[%c0_15, %c0_16] : memref<2x32xf32, #tpu.memory_space<vmem>>, vector<2x32xf32>
      tpu.vector_store %arg5[%c0_15, %c0_16], %16 {strides = array<i32>} : memref<2x32xf32, #tpu.memory_space<vmem>>, vector<2x32xf32>,
      %cst_17 = arith.constant 0.000000e+00 : f32
      %18 = vector.broadcast %cst_17 : f32 to vector<2x32xf32>
      %c0_18 = arith.constant 0 : index
      %c0_19 = arith.constant 0 : index
      %19 = vector.load %arg6[%c0_18, %c0_19] : memref<2x32xf32, #tpu.memory_space<vmem>>, vector<2x32xf32>
      tpu.vector_store %arg6[%c0_18, %c0_19], %18 {strides = array<i32>} : memref<2x32xf32, #tpu.memory_space<vmem>>, vector<2x32xf32>,
    } else {
    }
    %c0 = arith.constant 0 : index
    %c0_1 = arith.constant 0 : index
    %c0_2 = arith.constant 0 : index
    %3 = vector.load %arg2[%c0, %c0_1, %c0_2] : memref<2x8x32xf32, #tpu.memory_space<vmem>>, vector<2x8x32xf32>
    %c0_3 = arith.constant 0 : index
    %c0_4 = arith.constant 0 : index
    %4 = vector.load %arg5[%c0_3, %c0_4] : memref<2x32xf32, #tpu.memory_space<vmem>>, vector<2x32xf32>
    %cst = arith.constant dense<0.000000e+00> : vector<2x32xf32>
    %5 = vector.multi_reduction <add>, %3, %cst [1] : vector<2x8x32xf32> to vector<2x32xf32>
    %6 = arith.addf %4, %5 : vector<2x32xf32>
    %c0_5 = arith.constant 0 : index
    %c0_6 = arith.constant 0 : index
    %7 = vector.load %arg5[%c0_5, %c0_6] : memref<2x32xf32, #tpu.memory_space<vmem>>, vector<2x32xf32>
    tpu.vector_store %arg5[%c0_5, %c0_6], %6 {strides = array<i32>} : memref<2x32xf32, #tpu.memory_space<vmem>>, vector<2x32xf32>,
    %c0_7 = arith.constant 0 : index
    %c0_8 = arith.constant 0 : index
    %8 = vector.load %arg6[%c0_7, %c0_8] : memref<2x32xf32, #tpu.memory_space<vmem>>, vector<2x32xf32>
    %9 = arith.mulf %3, %3 : vector<2x8x32xf32>
    %cst_9 = arith.constant dense<0.000000e+00> : vector<2x32xf32>
    %10 = vector.multi_reduction <add>, %9, %cst_9 [1] : vector<2x8x32xf32> to vector<2x32xf32>
    %11 = arith.addf %8, %10 : vector<2x32xf32>
    %c0_10 = arith.constant 0 : index
    %c0_11 = arith.constant 0 : index
    %12 = vector.load %arg6[%c0_10, %c0_11] : memref<2x32xf32, #tpu.memory_space<vmem>>, vector<2x32xf32>
    tpu.vector_store %arg6[%c0_10, %c0_11], %11 {strides = array<i32>} : memref<2x32xf32, #tpu.memory_space<vmem>>, vector<2x32xf32>,
    %c0_i32_12 = arith.constant 0 : i32
    %13 = arith.cmpi eq, %arg1, %c0_i32_12 : i32
    %14 = arith.extui %13 : i1 to i32
    %c0_i32_13 = arith.constant 0 : i32
    %15 = arith.cmpi ne, %14, %c0_i32_13 : i32
    scf.if %15 {
      %c0_14 = arith.constant 0 : index
      %c0_15 = arith.constant 0 : index
      %16 = vector.load %arg5[%c0_14, %c0_15] : memref<2x32xf32, #tpu.memory_space<vmem>>, vector<2x32xf32>
      %cst_16 = arith.constant 1.250000e-01 : f32
      %17 = vector.broadcast %cst_16 : f32 to vector<2x32xf32>
      %18 = arith.mulf %16, %17 : vector<2x32xf32>
      %c0_17 = arith.constant 0 : index
      %c0_18 = arith.constant 0 : index
      %19 = vector.load %arg6[%c0_17, %c0_18] : memref<2x32xf32, #tpu.memory_space<vmem>>, vector<2x32xf32>
      %cst_19 = arith.constant 1.250000e-01 : f32
      %20 = vector.broadcast %cst_19 : f32 to vector<2x32xf32>
      %21 = arith.mulf %19, %20 : vector<2x32xf32>
      %22 = arith.mulf %18, %18 : vector<2x32xf32>
      %23 = arith.subf %21, %22 : vector<2x32xf32>
      %cst_20 = arith.constant 0.000000e+00 : f32
      %24 = vector.broadcast %cst_20 : f32 to vector<2x32xf32>
      %25 = arith.maximumf %23, %24 : vector<2x32xf32>
      %cst_21 = arith.constant 9.99999996E-13 : f32
      %26 = vector.broadcast %cst_21 : f32 to vector<2x32xf32>
      %27 = arith.addf %25, %26 : vector<2x32xf32>
      %28 = math.sqrt %27 : vector<2x32xf32>
      %c0_22 = arith.constant 0 : index
      %c0_23 = arith.constant 0 : index
      %29 = vector.load %arg3[%c0_22, %c0_23] : memref<2x32xf32, #tpu.memory_space<vmem>>, vector<2x32xf32>
      tpu.vector_store %arg3[%c0_22, %c0_23], %18 {strides = array<i32>} : memref<2x32xf32, #tpu.memory_space<vmem>>, vector<2x32xf32>,
      %c0_24 = arith.constant 0 : index
      %c0_25 = arith.constant 0 : index
      %30 = vector.load %arg4[%c0_24, %c0_25] : memref<2x32xf32, #tpu.memory_space<vmem>>, vector<2x32xf32>
      tpu.vector_store %arg4[%c0_24, %c0_25], %28 {strides = array<i32>} : memref<2x32xf32, #tpu.memory_space<vmem>>, vector<2x32xf32>,
    } else {
    }
    return
  }
  func.func @transform_0(%arg0: i32, %arg1: i32) -> (i32, i32, i32) {
    %c0_i32 = arith.constant 0 : i32
    %c0_i32_0 = arith.constant 0 : i32
    return %arg0, %arg1, %c0_i32 : i32, i32, i32
  }
  func.func @transform_1(%arg0: i32, %arg1: i32) -> (i32, i32) {
    %c0_i32 = arith.constant 0 : i32
    %c0_i32_0 = arith.constant 0 : i32
    return %arg0, %c0_i32 : i32, i32
  }
  func.func @transform_2(%arg0: i32, %arg1: i32) -> (i32, i32) {
    %c0_i32 = arith.constant 0 : i32
    %c0_i32_0 = arith.constant 0 : i32
    return %arg0, %c0_i32 : i32, i32
  }
}

</mosaic_0001>

<bundles_post_ra>
// kernel: statistic_pooling.1
= control target key start
LH: loop header
LB: loop body
LE: loop exit
PB: predicated region body
PF: predicated region fallthrough
CT: control target
= control target key end

     0   :  { %8 = vsyncpa [#allocation5], 0  ;;  %s148_s12 = smov [#allocation4]   ;;  %s149_s14 = smov 128   ;;  %s182_s0 = inlined_call_operand.hbm [shape: f32[2,8,32], index: 0, kind: input, shape index: {}]   ;;  %s183_s1 = inlined_call_operand.vmem [shape: f32[2,32], index: 1, kind: output, shape index: {0}]   ;;  %s184_s2 = inlined_call_operand.vmem [shape: f32[2,32], index: 2, kind: output, shape index: {1}]  }
   0x1   :  { %s13_s11 = sshll.u32 %s182_s0, 4  ;;  %s15_s13 = sshll.u32 %s148_s12, 4  ;;  %s14_s11 = int_to_ptr.hbm [resolvable:$true] %s13_s11  ;;  %s16_s13 = int_to_ptr.vmem [resolvable:$true] %s15_s13 }
   0x2   :  { %s150_s15 = smov 8  }
   0x3   :  { %21 = dma.hbm_to_vmem [thread:$0]  %s14_s11, 256, %s16_s13, [#allocation5], %s149_s14, %s149_s14, %s150_s15  }
   0x4   :  { %146 = dma.done.wait [#allocation5], 256  }
   0x5   :  { %147 = vsyncadd [#allocation5], 4294967040  ;;  %vm30_vm0 = vcmask 254976   ;;  %v151_v0 = vmov 0.0   ;;  %vm36_vm1 = vcmask 261120   ;;  %v33_v1 = vld [vmem:[#allocation4] sm:$0xff] }
   0x6   :  { %31 = vst.msk [vmem:[#allocation2] sm:$0x3] %vm30_vm0, %v151_v0  ;;  %v34_v2 = vld [vmem:[#allocation4 + $0x8] sm:$0xff]  ;;  %v37_v3 = vsel %vm36_vm1, %v33_v1, 0.0  ;;  %v60_v5 = vmul.f32 %v33_v1, %v33_v1  ;;  %vm53_vm2 = vcmask 1041409  }
   0x7   :  { %32 = vst.msk [vmem:[#allocation3] sm:$0x3] %vm30_vm0, %v151_v0  ;;  %v44_v4 = vsel %vm36_vm1, %v34_v2, 0.0  ;;  %v61_v6 = vmul.f32 %v34_v2, %v34_v2  ;;  %v38_v7 = vrot.slane %v37_v3, 4 }
   0x8   :  { %v45_v8 = vrot.slane %v44_v4, 4  ;;  %v62_v9 = vsel %vm36_vm1, %v60_v5, 0.0 }
   0x9   :  { %v69_v10 = vsel %vm36_vm1, %v61_v6, 0.0  ;;  %v39_v11 = vadd.f32 %v38_v7, %v37_v3  ;;  %v63_v13 = vrot.slane %v62_v9, 4 }
   0xa   :  { %v46_v12 = vadd.f32 %v45_v8, %v44_v4  ;;  %v70_v14 = vrot.slane %v69_v10, 4 }
   0xb   :  { %v40_v15 = vrot.slane %v39_v11, 2  ;;  %v64_v17 = vadd.f32 %v63_v13, %v62_v9 }
   0xc   :  { %v47_v16 = vrot.slane %v46_v12, 2  ;;  %v71_v18 = vadd.f32 %v70_v14, %v69_v10 }
   0xd   :  { %v41_v19 = vadd.f32 %v40_v15, %v39_v11  ;;  %v65_v21 = vrot.slane %v64_v17, 2  ;;  %v35_v27 = vld [vmem:[#allocation2] sm:$0x3] }
   0xe   :  { %v48_v20 = vadd.f32 %v47_v16, %v46_v12  ;;  %v72_v22 = vrot.slane %v71_v18, 2  ;;  %v59_v33 = vld [vmem:[#allocation3] sm:$0x3] }
   0xf   :  { %v42_v23 = vrot.slane %v41_v19, 1  ;;  %v66_v25 = vadd.f32 %v65_v21, %v64_v17 }
  0x10   :  { %v49_v24 = vrot.slane %v48_v20, 1  ;;  %v73_v26 = vadd.f32 %v72_v22, %v71_v18 }
  0x11   :  { %v43_v28 = vadd.f32 %v42_v23, %v41_v19  ;;  %v67_v30 = vrot.slane %v66_v25, 1 }
  0x12   :  { %v50_v29 = vadd.f32 %v49_v24, %v48_v20  ;;  %v74_v31 = vrot.slane %v73_v26, 1 }
  0x13   :  { %v68_v34 = vadd.f32 %v67_v30, %v66_v25 }
  0x14   :  { %v54_v32 = vsel %vm53_vm2, %v50_v29, %v43_v28  ;;  %v75_v35 = vadd.f32 %v74_v31, %v73_v26 }
  0x15   :  { %v56_v36 = vadd.f32 %v54_v32, %v35_v27 }
  0x16   :  { %v78_v37 = vsel %vm53_vm2, %v75_v35, %v68_v34 }
  0x17   :  { %58 = vst.msk [vmem:[#allocation2] sm:$0x3] %vm30_vm0, %v56_v36  ;;  %v80_v38 = vadd.f32 %v78_v37, %v59_v33 }
  0x19   :  { %81 = vst.msk [vmem:[#allocation3] sm:$0x3] %vm30_vm0, %v80_v38 }
  0x1e   :  { %v85_v39 = vld [vmem:[#allocation2] sm:$0x3] }
  0x1f   :  { %v86_v40 = vmul.f32 0.125, %v85_v39 }
  0x20   :  { %v87_v41 = vld [vmem:[#allocation3] sm:$0x3] }
  0x21   :  { %v88_v42 = vmul.f32 0.125, %v87_v41  ;;  %v89_v43 = vmul.f32 %v86_v40, %v86_v40  ;;  %105 = vst.msk [vmem:[%s183_s1] sm:$0x3] %vm30_vm0, %v86_v40 }
  0x23   :  { %v90_v44 = vsub.f32 %v88_v42, %v89_v43 }
  0x25   :  { %v91_v45 = vmax.f32 %v90_v44, 0.0 }
  0x27   :  { %v92_v46 = vadd.f32 1e-12, %v91_v45 }
  0x29   :  { %120 = vrsqrt.f32 %v92_v46  ;;  %vm100_vm3 = vcmp.eq.f32.partialorder %v92_v46, inf  ;;  %v103_v54 = vand.u32 2147483648, %v92_v46  ;;  %vm102_vm4 = vcmp.eq.f32.partialorder %v92_v46, 0.0 }
  0x2f   :  { %v121_v47 = vpop.eup %120 }
  0x30   :  { %v94_v48 = vmul.f32 %v121_v47, %v92_v46 }
  0x32   :  { %v95_v49 = vmul.f32 %v121_v47, %v94_v48 }
  0x34   :  { %v96_v50 = vmul.f32 0.5, %v95_v49 }
  0x36   :  { %v97_v51 = vsub.f32 1.5, %v96_v50 }
  0x38   :  { %v98_v52 = vmul.f32 %v121_v47, %v97_v51 }
  0x3a   :  { %v99_v53 = vmul.f32 %v98_v52, %v92_v46 }
  0x3c   :  { %v101_v55 = vsel %vm100_vm3, %v92_v46, %v99_v53 }
  0x3d   :  { %v104_v56 = vsel %vm102_vm4, %v103_v54, %v101_v55 }
  0x3e   :  { %106 = vst.msk [vmem:[%s184_s2] sm:$0x3] %vm30_vm0, %v104_v56 }
  0x3f   :  { %115 = vsyncpa [#allocation5], 1 }

</bundles_post_ra>
